<compile_context>
chip_gen: v7x
topology: tpu7x:2x2x1
jax: 0.10.0
libtpu: 0.0.40
codegen_flags: <defaults>
</compile_context>

<pallas_src>
import functools
import math

import jax
import jax.numpy as jnp
from jax.experimental import pallas as pl
from jax.experimental.pallas import tpu as pltpu


# ---------------------------------------------------------------------------
# pe buffer construction (same math as the torch __init__)
# ---------------------------------------------------------------------------
def make_pe(d_model: int, max_len: int = 5000) -> jnp.ndarray:
    position = jnp.arange(max_len, dtype=jnp.float32)[:, None]            # (max_len, 1)
    div_term = jnp.exp(
        jnp.arange(0, d_model, 2, dtype=jnp.float32) * (-math.log(10000.0) / d_model)
    )                                                                     # (d_model//2,)
    pe = jnp.zeros((max_len, d_model), dtype=jnp.float32)
    pe = pe.at[:, 0::2].set(jnp.sin(position * div_term))
    pe = pe.at[:, 1::2].set(jnp.cos(position * div_term))
    return pe[:, None, :]                                                 # (max_len, 1, d_model)


# ---------------------------------------------------------------------------
# Pallas kernels
# ---------------------------------------------------------------------------
def _pe_add_kernel(x_ref, pe_ref, o_ref):
    # Eval mode: dropout is identity.  Broadcast add (pe broadcasts over the
    # batch/sublane axis in the 3D layout; already expanded in the 2D layout).
    o_ref[...] = x_ref[...] + pe_ref[...]


def _pe_add_dropout_kernel(x_ref, pe_ref, bits_ref, o_ref, *, threshold, scale):
    # Training mode: add pe, then inverted dropout via an integer threshold on
    # uniform int32 bits: P(bits >= threshold) == 1 - p.  No int->float convert.
    y = x_ref[...] + pe_ref[...]
    keep = bits_ref[...] >= jnp.int32(threshold)
    o_ref[...] = jnp.where(keep, y * scale, jnp.zeros_like(y)).astype(o_ref.dtype)


# ---------------------------------------------------------------------------
# Tiling helpers
# ---------------------------------------------------------------------------
_VMEM_BUDGET_BYTES = 24 * 1024 * 1024   # double-buffered working-set cap (v7x-safe)
_VMEM_LIMIT_BYTES = 32 * 1024 * 1024    # raise v5e's 16 MiB default scoped limit


def _pick_seq_tile(S, row_bytes, sublane_constrained, budget=_VMEM_BUDGET_BYTES):
    """Largest divisor of S whose double-buffered footprint fits the budget."""
    limit = max(1, budget // (2 * row_bytes))
    if S <= limit:
        return S
    best = None
    for d in range(1, S + 1):
        if S % d or d > limit:
            continue
        # In the 2D layout the seq tile is the sublane axis of the block:
        # it must be a multiple of 8 or equal to the full extent.
        if sublane_constrained and (d % 8) and d != S:
            continue
        best = d
    return best if best is not None else S


# ---------------------------------------------------------------------------
# Wrapper (forward pass)
# ---------------------------------------------------------------------------
def positional_encoding_forward(x, pe, *, p: float = 0.1, training: bool = False,
                                rng_key=None, seq_tile: int | None = None):
    """x: (S, B, D). pe: (max_len, 1, D). Returns x + pe[:S] (+ dropout in training)."""
    S, B, D = x.shape
    dtype = x.dtype
    itemsize = jnp.dtype(dtype).itemsize

    if training and p >= 1.0:           # guard: 1/(1-p) would be inf
        return jnp.zeros_like(x)
    do_dropout = bool(training) and p > 0.0

    pe_s = pe[:S].reshape(S, D).astype(dtype)   # (S, D), kernel dtype == x dtype

    lane_dense_3d = (D % 128 == 0)
    if lane_dense_3d:
        # (ts, B, D) blocks: last dim D is lane-dense, pe is NOT expanded over batch.
        x_view = x
        pe_view = pe_s.reshape(S, 1, D)
        row_bytes = 2 * B * D * itemsize + D * itemsize
        if do_dropout:
            row_bytes += B * D * 4
        sublane_constrained = False
    else:
        # Collapse to (S, B*D) so the last block dim is as wide as possible;
        # pe is tiled over batch in the wrapper (cheap for small D).
        C = B * D
        x_view = x.reshape(S, C)
        pe_view = jnp.tile(pe_s.reshape(S, 1, D), (1, B, 1)).reshape(S, C)
        row_bytes = 3 * C * itemsize + (C * 4 if do_dropout else 0)
        sublane_constrained = True

    if seq_tile is not None:
        assert S % seq_tile == 0, "seq_tile must divide the sequence length"
        ts = seq_tile
    else:
        ts = _pick_seq_tile(S, row_bytes, sublane_constrained)
    grid = (S // ts,)

    if lane_dense_3d:
        big_spec = pl.BlockSpec((ts, B, D), lambda i: (i, 0, 0))
        pe_spec = pl.BlockSpec((ts, 1, D), lambda i: (i, 0, 0))
    else:
        big_spec = pl.BlockSpec((ts, B * D), lambda i: (i, 0))
        pe_spec = pl.BlockSpec((ts, B * D), lambda i: (i, 0))

    out_shape = jax.ShapeDtypeStruct(x_view.shape, dtype)
    cparams = pltpu.CompilerParams(
        dimension_semantics=("parallel",),          # independent seq tiles -> megacore
        vmem_limit_bytes=_VMEM_LIMIT_BYTES,
    )

    if not do_dropout:
        out = pl.pallas_call(
            _pe_add_kernel,
            out_shape=out_shape,
            grid=grid,
            in_specs=[big_spec, pe_spec],
            out_specs=big_spec,
            input_output_aliases={0: 0},            # in-place update of x
            compiler_params=cparams,
        )(x_view, pe_view)
        return out.reshape(S, B, D)

    # Training path: random bits are generated with jax.random and streamed in.
    # TODO(synk): on-TPU-only builds could use pltpu.prng_seed/prng_random_bits
    # in-kernel to drop this extra HBM stream; it has no CPU/interpret lowering.
    if rng_key is None:
        rng_key = jax.random.PRNGKey(0)
    bits = jax.lax.bitcast_convert_type(
        jax.random.bits(rng_key, x_view.shape, dtype=jnp.uint32), jnp.int32)
    # Signed threshold such that P(int32_bits >= threshold) == 1 - p.
    threshold = min(int(round(p * float(1 << 32))), (1 << 32) - 1) - (1 << 31)
    scale = 1.0 / (1.0 - p)

    out = pl.pallas_call(
        functools.partial(_pe_add_dropout_kernel, threshold=threshold, scale=scale),
        out_shape=out_shape,
        grid=grid,
        in_specs=[big_spec, pe_spec, big_spec],
        out_specs=big_spec,
        input_output_aliases={0: 0},                # in-place update of x
        compiler_params=cparams,
    )(x_view, pe_view, bits)
    return out.reshape(S, B, D)


# ---------------------------------------------------------------------------
# Main
# ---------------------------------------------------------------------------
if __name__ == "__main__":
    key = jax.random.PRNGKey(0)
    k1, k2, k3 = jax.random.split(key, 3)

    # Small shapes consistent with the module: seq=8, batch=2, d_model=32.
    S, B, D = 8, 2, 32
    P_DROP = 0.1
    x = jax.random.normal(k1, (S, B, D), dtype=jnp.float32)
    pe = make_pe(D, max_len=64)
    ref = x + pe[:S]                                 # eval-mode reference

    # Eval-mode forward (dropout = identity).
    out = jax.block_until_ready(positional_encoding_forward(x, pe, p=P_DROP, training=False))
    assert out.shape == (S, B, D) and out.dtype == x.dtype
    assert jnp.allclose(out, ref, atol=1e-6, rtol=1e-6), "eval-mode mismatch vs reference"

    # Training-mode forward (in-kernel inverted dropout with integer threshold).
    out_tr = jax.block_until_ready(
        positional_encoding_forward(x, pe, p=P_DROP, training=True, rng_key=k2))
    kept = out_tr != 0.0
    scale = 1.0 / (1.0 - P_DROP)
    assert jnp.allclose(jnp.where(kept, out_tr, 0.0),
                        jnp.where(kept, ref * scale, 0.0),
                        atol=1e-5, rtol=1e-5), "training-mode kept values mismatch"
    drop_frac = 1.0 - float(jnp.mean(kept.astype(jnp.float32)))
    assert 0.0 <= drop_frac <= 0.5                   # loose sanity bound on drop rate

    # Exercise the lane-dense (D % 128 == 0) path as well.
    S2, B2, D2 = 8, 2, 128
    x2 = jax.random.normal(k3, (S2, B2, D2), dtype=jnp.float32)
    pe2 = make_pe(D2, max_len=64)
    ref2 = x2 + pe2[:S2]
    out2 = jax.block_until_ready(positional_encoding_forward(x2, pe2, p=P_DROP, training=False))
    assert jnp.allclose(out2, ref2, atol=1e-6, rtol=1e-6), "lane-dense path mismatch"

    print("KERNEL_OK")
</pallas_src>

<mosaic_0001>
module attributes {stable_mosaic.version = 11 : i64} {
  func.func @_pe_add_kernel(%arg0: i32, %arg1: memref<8x64xf32, #tpu.memory_space<vmem>>, %arg2: memref<8x64xf32, #tpu.memory_space<vmem>>, %arg3: memref<8x64xf32, #tpu.memory_space<vmem>>) attributes {dimension_semantics = [#tpu.dimension_semantics<parallel>], iteration_bounds = array<i64: 1>, scalar_prefetch = 0 : i64, scratch_operands = 0 : i64, tpu.core_type = #tpu.core_type<tc>, window_params = [{transform_indices = @transform_0, window_bounds = array<i64: 8, 64>}, {transform_indices = @transform_1, window_bounds = array<i64: 8, 64>}, {transform_indices = @transform_2, window_bounds = array<i64: 8, 64>}]} {
    %c0 = arith.constant 0 : index
    %c0_0 = arith.constant 0 : index
    %0 = vector.load %arg1[%c0, %c0_0] : memref<8x64xf32, #tpu.memory_space<vmem>>, vector<8x64xf32>
    %c0_1 = arith.constant 0 : index
    %c0_2 = arith.constant 0 : index
    %1 = vector.load %arg2[%c0_1, %c0_2] : memref<8x64xf32, #tpu.memory_space<vmem>>, vector<8x64xf32>
    %2 = arith.addf %0, %1 : vector<8x64xf32>
    %c0_3 = arith.constant 0 : index
    %c0_4 = arith.constant 0 : index
    %3 = vector.load %arg3[%c0_3, %c0_4] : memref<8x64xf32, #tpu.memory_space<vmem>>, vector<8x64xf32>
    tpu.vector_store %arg3[%c0_3, %c0_4], %2 {strides = array<i32>} : memref<8x64xf32, #tpu.memory_space<vmem>>, vector<8x64xf32>,
    return
  }
  func.func @transform_0(%arg0: i32) -> (i32, i32) {
    %c0_i32 = arith.constant 0 : i32
    %c0_i32_0 = arith.constant 0 : i32
    return %arg0, %c0_i32 : i32, i32
  }
  func.func @transform_1(%arg0: i32) -> (i32, i32) {
    %c0_i32 = arith.constant 0 : i32
    %c0_i32_0 = arith.constant 0 : i32
    return %arg0, %c0_i32 : i32, i32
  }
  func.func @transform_2(%arg0: i32) -> (i32, i32) {
    %c0_i32 = arith.constant 0 : i32
    %c0_i32_0 = arith.constant 0 : i32
    return %arg0, %c0_i32 : i32, i32
  }
}

</mosaic_0001>

<bundles_post_ra>
// kernel: tpu_custom_call.1
= control target key start
LH: loop header
LB: loop body
LE: loop exit
PB: predicated region body
PF: predicated region fallthrough
CT: control target
= control target key end

     0   :  { %7 = vsyncpa [#allocation3], 0  ;;  %s138_s0 = inlined_call_operand.hbm [shape: f32[8,64], index: 0, kind: input, shape index: {}, may-alias: {0,2}]   ;;  %s139_s1 = inlined_call_operand.vmem [shape: f32[8,64], index: 1, kind: input, shape index: {}]   ;;  %s140_s2 = inlined_call_operand.hbm [shape: f32[8,64], index: 2, kind: output, shape index: {}, may-alias: {0,2}]  }
   0x1   :  { %8 = vsyncpa [#allocation4], 0  ;;  %s94_s9 = smov [#allocation2]   ;;  %s46_s13 = scalar_lea.hbm %s138_s0, 128 }
   0x2   :  { %s15_s10 = sshll.u32 %s94_s9, 4  ;;  %p47_p0 = scmp.ne.s32.totalorder %s138_s0, %s46_s13  ;;  %s16_s10 = int_to_ptr.vmem [resolvable:$true] %s15_s10 }
   0x3   :  { %p50_p1 = scmp.lt.u32.totalorder %s46_s13, %s138_s0 }
   0x5   :  { %p52_p2 = pnand %p50_p1, %p47_p0 }
   0x7   :  { %55 = shalt.err (!%p52_p2)
}
   0x8   :  { %s56_s18 = scalar_lea.vmem %s16_s10, 128  ;;  %p61_p4 = scmp.lt.s32.totalorder %s16_s10, %s16_s10 }
   0x9   :  { %p57_p3 = scmp.ne.s32.totalorder %s16_s10, %s56_s18  ;;  %p62_p5 = scmp.lt.s32.totalorder %s56_s18, %s56_s18 }
   0xb   :  { %p63_p6 = por %p62_p5, %p61_p4 }
   0xd   :  { %p64_p7 = pnand %p63_p6, %p57_p3 }
   0xf   :  { %67 = shalt.err (!%p64_p7)
}
  0x10   :  { %18 = dma.hbm_to_vmem [thread:$0]  %s138_s0, 128, %s16_s10, [#allocation3]  }
  0x11   :  { %90 = dma.done.wait [#allocation3], 128  }
  0x12   :  { %91 = vsyncadd [#allocation3], 4294967168  ;;  %s95_s21 = smov [#allocation5]   ;;  %v24_v0 = vld [vmem:[#allocation2] sm:$0xff]  ;;  %vm27_vm0 = vcmask 523264  }
  0x13   :  { %s35_s22 = sshll.u32 %s95_s21, 4  ;;  %v25_v1 = vld [vmem:[%s139_s1] sm:$0xff]  ;;  %s36_s22 = int_to_ptr.vmem [resolvable:$true] %s35_s22 }
  0x14   :  { %v26_v2 = vadd.f32 %v25_v1, %v24_v0  ;;  %s68_s25 = scalar_lea.vmem %s36_s22, 128  ;;  %p73_p9 = scmp.lt.s32.totalorder %s36_s22, %s36_s22 }
  0x15   :  { %p69_p8 = scmp.ne.s32.totalorder %s36_s22, %s68_s25  ;;  %p74_p10 = scmp.lt.s32.totalorder %s68_s25, %s68_s25 }
  0x16   :  { %28 = vst.msk [vmem:[#allocation5] sm:$0xff] %vm27_vm0, %v26_v2 }
  0x17   :  { %p75_p11 = por %p74_p10, %p73_p9 }
  0x19   :  { %p76_p12 = pnand %p75_p11, %p69_p8 }
  0x1b   :  { %79 = shalt.err (!%p76_p12)
}
  0x1c   :  { %s80_s27 = scalar_lea.hbm %s140_s2, 128 }
  0x1d   :  { %p81_p13 = scmp.ne.s32.totalorder %s140_s2, %s80_s27  ;;  %p84_p0 = scmp.lt.u32.totalorder %s80_s27, %s140_s2 }
  0x1f   :  { %p86_p1 = pnand %p84_p0, %p81_p13 }
  0x21   :  { %89 = shalt.err (!%p86_p1)
}
  0x22   :  { %38 = dma.vmem_to_hbm [thread:$0]  %s36_s22, 128, %s140_s2, [#allocation4]  }
  0x23   :  { %92 = dma.done.wait [#allocation4], 128  }
  0x24   :  { %93 = vsyncadd [#allocation4], 4294967168 }
  0x25   :  { %42 = vsyncpa [#allocation3], 1 }
  0x26   :  { %43 = vsyncpa [#allocation4], 1 }

</bundles_post_ra>
